<compile_context>
chip_gen: v7x
topology: tpu7x:2x2x1
jax: 0.10.0
libtpu: 0.0.40
codegen_flags: <defaults>
</compile_context>

<pallas_src>
import jax
import jax.numpy as jnp
from jax import lax
from jax.experimental import pallas as pl
from jax.experimental.pallas import tpu as pltpu


def _cdiv(a, b):
    return -(-a // b)


def _round_up(a, b):
    return _cdiv(a, b) * b


def _vmem_budget_bytes():
    """Per-chip VMEM budget with headroom (v5e/v6e ~96 MiB, v7x ~48 MiB)."""
    cap = 64 * 1024 * 1024  # conservative fallback: v7x per-TC VMEM
    try:
        cap = int(pltpu.get_tpu_info().vmem_capacity_bytes)
    except Exception:
        pass
    return min(100 * 1024 * 1024, (cap * 3) // 4)


# ----------------------------- kernels ---------------------------------------


def _pred_avg_kernel_fast(x_ref, w_ref, b_ref, o_ref):
    # Fast path: whole HW in one block -> no accumulator, no init/finalize branches.
    # x_ref: (TB, C_in, HW)  w_ref: (C_in, C_out) (pre-scaled by 1/HW)
    # b_ref: (1, C_out)      o_ref: (TB, C_out)
    pooled = jnp.sum(x_ref[...].astype(jnp.float32), axis=-1)          # (TB, C_in)
    out = jnp.dot(pooled, w_ref[...], preferred_element_type=jnp.float32) + b_ref[...]
    o_ref[...] = out.astype(o_ref.dtype)


def _make_tiled_kernel(hw, thw):
    # Fallback for very large HW: grid = (batch tiles, hw tiles), f32 accumulator.
    ragged = (hw % thw) != 0

    def kernel(x_ref, w_ref, b_ref, o_ref, acc_ref):
        k = pl.program_id(1)

        @pl.when(k == 0)
        def _init():
            acc_ref[...] = jnp.zeros_like(acc_ref)

        x = x_ref[...].astype(jnp.float32)                              # (TB, C_in, THW)
        if ragged:
            # Zero lanes past the true HW bound; on full tiles valid >= THW so
            # the mask is a no-op.  Replaces the old wrapper-side jnp.pad.
            valid = hw - k * thw
            lane = lax.broadcasted_iota(jnp.int32, x.shape, x.ndim - 1)
            x = jnp.where(lane < valid, x, 0.0)
        acc_ref[...] += jnp.sum(x, axis=-1)                             # (TB, C_in)

        @pl.when(k == pl.num_programs(1) - 1)
        def _finalize():
            out = jnp.dot(acc_ref[...], w_ref[...],
                          preferred_element_type=jnp.float32) + b_ref[...]
            o_ref[...] = out.astype(o_ref.dtype)

    return kernel


# ----------------------------- wrapper ----------------------------------------


def pred_avg_forward(x_nchw, weight, bias):
    """x_nchw: (N, C_in, H, W); weight: (C_out, C_in); bias: (C_out,)."""
    n, c_in, h, w = x_nchw.shape
    c_out = weight.shape[0]
    hw = h * w
    itemsize = x_nchw.dtype.itemsize

    # Fold the 1/HW mean into the tiny transposed weight (one-off, off the hot path).
    w_t_scaled = (weight.astype(jnp.float32) / float(hw)).T             # (C_in, C_out)
    bias_2d = bias.astype(jnp.float32).reshape(1, c_out)

    x_flat = x_nchw.reshape(n, c_in, hw)                                # free (contiguous)

    budget = _vmem_budget_bytes()
    x_buf_cap = budget // 3                                             # one of two stream buffers
    sub = max(8, 32 // itemsize)                                        # sublane pack: f32 8, bf16 16, i8 32
    c_in_pad = _round_up(c_in, sub)

    target_block_bytes = 8 * 1024 * 1024                                # amortise per-step overhead
    row_hbm = c_in * hw * itemsize                                      # HBM bytes per batch row
    row_vmem = c_in_pad * _round_up(hw, 128) * itemsize                 # VMEM bytes per row (thw = hw)

    out_shape = jax.ShapeDtypeStruct((n, c_out), x_nchw.dtype)
    cost = pl.CostEstimate(
        flops=n * c_in * hw + 2 * n * c_in * c_out,
        transcendentals=0,
        bytes_accessed=(n * c_in * hw + n * c_out) * itemsize + (c_in * c_out + c_out) * 4,
    )

    min_tb = n if n <= 8 else 8
    use_fast = min_tb * row_vmem <= x_buf_cap

    if use_fast:
        # ---------------- fast path: full HW per block, 1-D grid ------------------
        vmem_rows = max(1, x_buf_cap // row_vmem)
        rows = max(1, min(target_block_bytes // max(row_hbm, 1), vmem_rows))
        if n <= 8:
            tb = n                                  # block dim == full dim (legal for any n)
        else:
            rows = min(rows, _cdiv(n, 2))           # keep >= 2 programs for v7x megacore
            rows = min(max(rows, 8), vmem_rows)     # out-block sublane dim must be mult of 8
            tb = (rows // 8) * 8
        grid = (_cdiv(n, tb),)

        x_vmem = tb * c_in_pad * _round_up(hw, 128) * itemsize
        vmem_limit = int(min(budget, max(8 << 20, 2 * x_vmem + (4 << 20))))

        return pl.pallas_call(
            _pred_avg_kernel_fast,
            out_shape=out_shape,
            grid_spec=pltpu.PrefetchScalarGridSpec(
                num_scalar_prefetch=0,
                grid=grid,
                in_specs=[
                    pl.BlockSpec((tb, c_in, hw), lambda i: (i, 0, 0)),
                    pl.BlockSpec((c_in, c_out), lambda i: (0, 0)),
                    pl.BlockSpec((1, c_out), lambda i: (0, 0)),
                ],
                out_specs=pl.BlockSpec((tb, c_out), lambda i: (i, 0)),
            ),
            compiler_params=pltpu.CompilerParams(
                dimension_semantics=("parallel",),
                vmem_limit_bytes=vmem_limit,
            ),
            cost_estimate=cost,
        )(x_flat, w_t_scaled, bias_2d)

    # -------------- tiled path: HW too large for one block ------------------------
    # TODO(synk): for N == 1 on v7x, a 2-way split of the HW reduction across the two
    # TensorCores (extra parallel axis + wrapper-side sum of partials) would use both cores.
    tb = n if n <= 8 else 8
    lanes_cap = max(128, x_buf_cap // (tb * c_in_pad * itemsize))
    thw = max(128, (lanes_cap // 128) * 128)
    thw = min(thw, _round_up(hw, 128))
    grid = (_cdiv(n, tb), _cdiv(hw, thw))

    x_vmem = tb * c_in_pad * thw * itemsize
    vmem_limit = int(min(budget, max(8 << 20, 2 * x_vmem + (4 << 20))))

    return pl.pallas_call(
        _make_tiled_kernel(hw, thw),
        out_shape=out_shape,
        grid_spec=pltpu.PrefetchScalarGridSpec(
            num_scalar_prefetch=0,
            grid=grid,
            in_specs=[
                pl.BlockSpec((tb, c_in, thw), lambda i, k: (i, 0, k)),
                pl.BlockSpec((c_in, c_out), lambda i, k: (0, 0)),
                pl.BlockSpec((1, c_out), lambda i, k: (0, 0)),
            ],
            out_specs=pl.BlockSpec((tb, c_out), lambda i, k: (i, 0)),
            scratch_shapes=[pltpu.VMEM((tb, c_in), jnp.float32)],
        ),
        compiler_params=pltpu.CompilerParams(
            dimension_semantics=("parallel", "arbitrary"),
            vmem_limit_bytes=vmem_limit,
        ),
        cost_estimate=cost,
    )(x_flat, w_t_scaled, bias_2d)


def reference_forward(x_nchw, weight, bias):
    # Pure-JAX reference: 1x1 conv == einsum over channels, then global avg pool.
    y = jnp.einsum("nchw,oc->nohw", x_nchw, weight) + bias[None, :, None, None]
    return jnp.mean(y, axis=(2, 3))


if __name__ == "__main__":
    key = jax.random.PRNGKey(0)
    k_x, k_w, k_b = jax.random.split(key, 3)

    N, C_IN, H, W = 2, 4, 16, 16
    C_OUT = 8

    x = jax.random.normal(k_x, (N, C_IN, H, W), dtype=jnp.float32)
    # Synthetic Conv2d(C_in, C_out, kernel_size=1) parameters.
    weight = jax.random.normal(k_w, (C_OUT, C_IN), dtype=jnp.float32) * 0.1
    bias = jax.random.normal(k_b, (C_OUT,), dtype=jnp.float32) * 0.1

    out = pred_avg_forward(x, weight, bias)
    out = jax.block_until_ready(out)

    ref = reference_forward(x, weight, bias)
    assert out.shape == (N, C_OUT), out.shape
    assert jnp.allclose(out, ref, atol=1e-5, rtol=1e-5), (
        f"max abs err {jnp.max(jnp.abs(out - ref))}"
    )
    print("KERNEL_OK")
</pallas_src>

<mosaic_0001>
module attributes {stable_mosaic.version = 11 : i64} {
  func.func @_pred_avg_kernel_fast(%arg0: i32, %arg1: memref<2x4x256xf32, #tpu.memory_space<vmem>>, %arg2: memref<4x8xf32, #tpu.memory_space<vmem>>, %arg3: memref<1x8xf32, #tpu.memory_space<vmem>>, %arg4: memref<2x8xf32, #tpu.memory_space<vmem>>) attributes {dimension_semantics = [#tpu.dimension_semantics<parallel>], iteration_bounds = array<i64: 1>, scalar_prefetch = 0 : i64, scratch_operands = 0 : i64, tpu.core_type = #tpu.core_type<tc>, window_params = [{transform_indices = @transform_0, window_bounds = array<i64: 2, 4, 256>}, {pipeline_mode = #tpu.pipeline_mode<synchronous>, transform_indices = @transform_1, window_bounds = array<i64: 4, 8>}, {pipeline_mode = #tpu.pipeline_mode<synchronous>, transform_indices = @transform_2, window_bounds = array<i64: 1, 8>}, {transform_indices = @transform_3, window_bounds = array<i64: 2, 8>}]} {
    %c0 = arith.constant 0 : index
    %c0_0 = arith.constant 0 : index
    %c0_1 = arith.constant 0 : index
    %0 = vector.load %arg1[%c0, %c0_0, %c0_1] : memref<2x4x256xf32, #tpu.memory_space<vmem>>, vector<2x4x256xf32>
    %cst = arith.constant dense<0.000000e+00> : vector<2x4xf32>
    %1 = vector.multi_reduction <add>, %0, %cst [2] : vector<2x4x256xf32> to vector<2x4xf32>
    %c0_2 = arith.constant 0 : index
    %c0_3 = arith.constant 0 : index
    %2 = vector.load %arg2[%c0_2, %c0_3] : memref<4x8xf32, #tpu.memory_space<vmem>>, vector<4x8xf32>
    %cst_4 = arith.constant dense<0.000000e+00> : vector<2x8xf32>
    %3 = tpu.matmul %1, %2, %cst_4 {dimension_numbers = #tpu.dot_dimension_numbers<[1], [0], [0], [1], [0, 0, 1, 1], [], []>} : vector<2x4xf32>, vector<4x8xf32>, vector<2x8xf32> -> vector<2x8xf32>
    %c0_5 = arith.constant 0 : index
    %c0_6 = arith.constant 0 : index
    %4 = vector.load %arg3[%c0_5, %c0_6] : memref<1x8xf32, #tpu.memory_space<vmem>>, vector<1x8xf32>
    %5 = vector.broadcast %4 : vector<1x8xf32> to vector<2x8xf32>
    %6 = arith.addf %3, %5 : vector<2x8xf32>
    %c0_7 = arith.constant 0 : index
    %c0_8 = arith.constant 0 : index
    %7 = vector.load %arg4[%c0_7, %c0_8] : memref<2x8xf32, #tpu.memory_space<vmem>>, vector<2x8xf32>
    tpu.vector_store %arg4[%c0_7, %c0_8], %6 {strides = array<i32>} : memref<2x8xf32, #tpu.memory_space<vmem>>, vector<2x8xf32>,
    return
  }
  func.func @transform_0(%arg0: i32) -> (i32, i32, i32) {
    %c0_i32 = arith.constant 0 : i32
    %c0_i32_0 = arith.constant 0 : i32
    %c0_i32_1 = arith.constant 0 : i32
    return %arg0, %c0_i32, %c0_i32_0 : i32, i32, i32
  }
  func.func @transform_1(%arg0: i32) -> (i32, i32) {
    %c0_i32 = arith.constant 0 : i32
    %c0_i32_0 = arith.constant 0 : i32
    %c0_i32_1 = arith.constant 0 : i32
    return %c0_i32, %c0_i32_0 : i32, i32
  }
  func.func @transform_2(%arg0: i32) -> (i32, i32) {
    %c0_i32 = arith.constant 0 : i32
    %c0_i32_0 = arith.constant 0 : i32
    %c0_i32_1 = arith.constant 0 : i32
    return %c0_i32, %c0_i32_0 : i32, i32
  }
  func.func @transform_3(%arg0: i32) -> (i32, i32) {
    %c0_i32 = arith.constant 0 : i32
    %c0_i32_0 = arith.constant 0 : i32
    return %arg0, %c0_i32 : i32, i32
  }
}

</mosaic_0001>

<bundles_post_ra>
// kernel: tpu_custom_call.1
= control target key start
LH: loop header
LB: loop body
LE: loop exit
PB: predicated region body
PF: predicated region fallthrough
CT: control target
= control target key end

     0   :  { %8 = vsyncpa [#allocation3], 0  ;;  %s338_s0 = inlined_call_operand.hbm [shape: f32[2,4,256], index: 0, kind: input, shape index: {}]   ;;  %s339_s1 = inlined_call_operand.hbm [shape: f32[4,8], index: 1, kind: input, shape index: {}]   ;;  %s340_s2 = inlined_call_operand.vmem [shape: f32[1,8], index: 2, kind: input, shape index: {}]   ;;  %s341_s3 = inlined_call_operand.hbm [shape: f32[2,8], index: 3, kind: output, shape index: {}]  }
   0x1   :  { %9 = vsyncpa [#allocation6], 0 }
   0x2   :  { %10 = vsyncpa [#allocation4], 0  ;;  %s267_s12 = smov [#allocation2]   ;;  %s195_s16 = scalar_lea.hbm %s338_s0, 256 }
   0x3   :  { %s16_s13 = sshll.u32 %s267_s12, 4  ;;  %p196_p0 = scmp.ne.s32.totalorder %s338_s0, %s195_s16  ;;  %s17_s13 = int_to_ptr.vmem [resolvable:$true] %s16_s13 }
   0x4   :  { %p199_p1 = scmp.lt.u32.totalorder %s195_s16, %s338_s0 }
   0x6   :  { %p201_p2 = pnand %p199_p1, %p196_p0 }
   0x8   :  { %204 = shalt.err (!%p201_p2)
}
   0x9   :  { %s205_s21 = scalar_lea.vmem %s17_s13, 256  ;;  %p210_p4 = scmp.lt.s32.totalorder %s17_s13, %s17_s13 }
   0xa   :  { %p206_p3 = scmp.ne.s32.totalorder %s17_s13, %s205_s21  ;;  %p211_p5 = scmp.lt.s32.totalorder %s205_s21, %s205_s21 }
   0xc   :  { %p212_p6 = por %p211_p5, %p210_p4 }
   0xe   :  { %p213_p7 = pnand %p212_p6, %p206_p3 }
  0x10   :  { %216 = shalt.err (!%p213_p7)
}
  0x11   :  { %s268_s22 = smov 128   ;;  %s269_s23 = smov 8  }
  0x12   :  { %22 = dma.hbm_to_vmem [thread:$0]  %s338_s0, 256, %s17_s13, [#allocation3], %s268_s22, %s268_s22, %s269_s23  }
  0x13   :  { %s270_s26 = smov [#allocation5]   ;;  %s217_s30 = scalar_lea.hbm %s339_s1, 64 }
  0x14   :  { %s29_s27 = sshll.u32 %s270_s26, 4  ;;  %p218_p8 = scmp.ne.s32.totalorder %s339_s1, %s217_s30  ;;  %s30_s27 = int_to_ptr.vmem [resolvable:$true] %s29_s27 }
  0x15   :  { %p221_p9 = scmp.lt.u32.totalorder %s217_s30, %s339_s1 }
  0x17   :  { %p223_p10 = pnand %p221_p9, %p218_p8 }
  0x19   :  { %226 = shalt.err (!%p223_p10)
}
  0x1a   :  { %s227_s8 = scalar_lea.vmem %s30_s27, 64  ;;  %p232_p12 = scmp.lt.s32.totalorder %s30_s27, %s30_s27 }
  0x1b   :  { %p228_p11 = scmp.ne.s32.totalorder %s30_s27, %s227_s8  ;;  %p233_p13 = scmp.lt.s32.totalorder %s227_s8, %s227_s8 }
  0x1d   :  { %p234_p0 = por %p233_p13, %p232_p12 }
  0x1f   :  { %p235_p1 = pnand %p234_p0, %p228_p11 }
  0x21   :  { %238 = shalt.err (!%p235_p1)
}
  0x22   :  { %32 = dma.hbm_to_vmem [thread:$0]  %s339_s1, 64, %s30_s27, [#allocation6]  }
  0x23   :  { %261 = dma.done.wait [#allocation3], 256  }
  0x24   :  { %262 = vsyncadd [#allocation3], 4294967040 }
  0x25   :  { %263 = dma.done.wait [#allocation6], 64  }
  0x26   :  { %264 = vsyncadd [#allocation6], 4294967232  ;;  %vm49_vm0 = vcmask 1043456   ;;  %v41_v0 = vld [vmem:[#allocation2] sm:$0xff]  ;;  %v42_v1 = vld [vmem:[#allocation2 + $0x8] sm:$0xff]  ;;  %v271_v11 = vmov 0.0   ;;  %v70_v12 = vlaneseq }
  0x27   :  { %v45_v2 = vcombine.high %v41_v0, %v41_v0  ;;  %v50_v3 = vsel %vm49_vm0, %v41_v0, 0.0  ;;  %v46_v4 = vcombine.high %v42_v1, %v42_v1  ;;  %v55_v6 = vsel %vm49_vm0, %v42_v1, 0.0  ;;  %v60_v10 = vld [vmem:[#allocation5] sm:$0xf]  ;;  %181 = vmatprep.subr.mxu0 %v271_v11  ;;  %v176_v21 = vld [vmem:[%s340_s2] ss:$0 sm:$0xff] }
  0x28   :  { %vm272_vm1 = vmmov 0   ;;  %182 = vmatpush3.msk.msra.mxu0 %vm49_vm0, %v60_v10  ;;  %v71_v13 = vand.u32 127, %v70_v12  ;;  %v73_v14 = vshrl.u32 %v70_v12, 7  ;;  %vm80_vm2 = vcmask 1041409   ;;  %s273_s11 = smov [#allocation7]  }
  0x29   :  { %v51_v5 = vsel %vm49_vm0, %v45_v2, 0.0  ;;  %v56_v7 = vsel %vm49_vm0, %v46_v4, 0.0  ;;  %183 = vmatprep.mubr.msk.f32.mxu0 %vm272_vm1, %v271_v11  ;;  %vm82_vm3 = vcmask 31744   ;;  %s166_s12 = sshll.u32 %s273_s11, 4  ;;  %vm158_vm4 = vcmask 58368   ;;  %s167_s12 = int_to_ptr.vmem [resolvable:$true] %s166_s12 }
  0x2a   :  { %v52_v8 = vadd.f32 %v51_v5, %v50_v3  ;;  %v57_v9 = vadd.f32 %v56_v7, %v55_v6  ;;  %v74_v16 = vsub.s32 %v71_v13, %v73_v14  ;;  %s239_s13 = scalar_lea.vmem %s167_s12, 32  ;;  %p244_p3 = scmp.lt.s32.totalorder %s167_s12, %s167_s12 }
  0x2b   :  { %p240_p2 = scmp.ne.s32.totalorder %s167_s12, %s239_s13  ;;  %p245_p4 = scmp.lt.s32.totalorder %s239_s13, %s239_s13 }
  0x2c   :  { %53 = vadd.xlane.f32.xlu0 %v52_v8 }
  0x2d   :  { %p246_p5 = por %p245_p4, %p244_p3 }
  0x2f   :  { %p247_p6 = pnand %p246_p5, %p240_p2 }
  0x30   :  { %58 = vadd.xlane.f32.xlu0 %v57_v9 }
  0xb9   :  { %v54_v15 = vpop.xlane.xlu0 %53 }
  0xba   :  { %v75_v18 = vrot.slane %v54_v15, %v74_v16 }
  0xbd   :  { %v59_v17 = vpop.xlane.xlu0 %58 }
  0xbe   :  { %v79_v19 = vrot.slane %v59_v17, %v74_v16 }
  0xc0   :  { %v81_v20 = vsel %vm80_vm2, %v79_v19, %v75_v18 }
  0xc1   :  { %184 = vmatmul.mubr.msk.f32.vlgmr.msra.gmra.mrb[0].mxu0 %vm82_vm3, %v81_v20 }
 0x194   :  { %v154_v22 = vpop.f32.mrb[0].mxu0 }
 0x195   :  { %v155_v23 = vadd.f32 %v176_v21, %v154_v22  ;;  %v185_v24 = vpop.f32.mrb[1].mxu0 }
 0x197   :  { %159 = vst.msk [vmem:[#allocation7] sm:$0x3] %vm158_vm4, %v155_v23 }
 0x198   :  { %250 = shalt.err (!%p247_p6)
}
 0x199   :  { %s251_s16 = scalar_lea.hbm %s341_s3, 32 }
 0x19a   :  { %p252_p7 = scmp.ne.s32.totalorder %s341_s3, %s251_s16  ;;  %p255_p8 = scmp.lt.u32.totalorder %s251_s16, %s341_s3 }
 0x19c   :  { %p257_p9 = pnand %p255_p8, %p252_p7 }
 0x19e   :  { %260 = shalt.err (!%p257_p9)
}
 0x19f   :  { %169 = dma.vmem_to_hbm [thread:$0]  %s167_s12, 32, %s341_s3, [#allocation4]  }
 0x1a0   :  { %265 = dma.done.wait [#allocation4], 32  }
 0x1a1   :  { %266 = vsyncadd [#allocation4], 4294967264 }
 0x1a2   :  { %173 = vsyncpa [#allocation3], 1 }
 0x1a3   :  { %174 = vsyncpa [#allocation6], 1 }
 0x1a4   :  { %175 = vsyncpa [#allocation4], 1 }

</bundles_post_ra>
